<compile_context>
chip_gen: v5e
topology: v5e:2x2
jax: 0.10.0
libtpu: 0.0.40
codegen_flags: <defaults>
</compile_context>

<pallas_src>
import functools

import jax
import jax.numpy as jnp
from jax.experimental import pallas as pl
from jax.experimental.pallas import tpu as pltpu


_VMEM_LIMIT_BYTES = 32 * 1024 * 1024   # scoped-VMEM safe on v5e / v6e / v7x
_BLOCK_BYTES = 6 * 1024 * 1024         # per-block target; 2*(in+out) ~ 24 MiB
_FUSED_MAX_BYTES = 6 * 1024 * 1024     # single-block fused global path
_Z_TYPICAL = {4: (0.077, 1.013), 8: (0.027, 1.114)}


def _row_tile(n, f, itemsize, block_bytes):
    """Rows per block: full N if it fits (or N<=8); otherwise a multiple of 8
    that preferably divides N (largest such under the byte cap)."""
    row_bytes = f * itemsize
    if n <= 8 or n * row_bytes <= block_bytes:
        # TODO(synk): N<=8 with enormous F rows would need F tiling + lane
        # masking; not needed for realistic conv/FC weight shapes.
        return n
    cap = max(8, (block_bytes // row_bytes) // 8 * 8)
    t = cap
    while t >= 8:
        if n % t == 0:
            return t
        t -= 8
    return cap


# ----------------------------------------------------------------------------
# channel_wise = 0 (RoundQuant) path
# ----------------------------------------------------------------------------
def _global_fused_kernel(x_ref, o_ref, *, n_lv, inv_total):
    """Whole tensor in one block: stats + quantize fused in a single body."""
    x = x_ref[...].astype(jnp.float32)
    m = jnp.sum(jnp.abs(x)) * inv_total
    alpha = 2.0 * m
    scale = n_lv / alpha                   # one scalar divide per call
    inv_scale = alpha * (1.0 / n_lv)
    o_ref[...] = (jnp.round(x * scale) * inv_scale).astype(o_ref.dtype)


def _abs_sum_kernel(x_ref, o_ref, *, tn, n_rows, ragged):
    """Tiled sum(|x|) accumulated into a resident (1,1) output."""
    @pl.when(pl.program_id(0) == 0)
    def _():
        o_ref[...] = jnp.zeros_like(o_ref)

    xa = jnp.abs(x_ref[...].astype(jnp.float32))
    if ragged:  # static switch: mask garbage rows of the ragged last block
        row = (jax.lax.broadcasted_iota(jnp.int32, xa.shape, 0)
               + pl.program_id(0) * tn)
        xa = jnp.where(row < n_rows, xa, 0.0)
    o_ref[...] = o_ref[...] + jnp.sum(xa)


def _global_quant_kernel(s_ref, x_ref, o_ref, *, n_lv, inv_total):
    """out = round(x*scale) * inv_scale; scale is derived in-kernel from the
    abs-sum passed through SMEM (no XLA scalar glue between the passes)."""
    m = s_ref[0, 0] * inv_total
    alpha = 2.0 * m
    scale = n_lv / alpha
    inv_scale = alpha * (1.0 / n_lv)
    x = x_ref[...].astype(jnp.float32)
    o_ref[...] = (jnp.round(x * scale) * inv_scale).astype(o_ref.dtype)


def _wq_global(x, n_lv, *, fused_max_bytes=_FUSED_MAX_BYTES,
               block_bytes=_BLOCK_BYTES):
    orig_shape = x.shape
    n = int(orig_shape[0])
    f = int(x.size) // n
    total = n * f
    x2 = x.reshape(n, f)                   # free reshape, no pad

    if total * x.dtype.itemsize <= fused_max_bytes:
        # fused single-block path: one read + one write of x, one launch
        out2 = pl.pallas_call(
            functools.partial(_global_fused_kernel, n_lv=n_lv,
                              inv_total=1.0 / total),
            out_shape=jax.ShapeDtypeStruct((n, f), x.dtype),
            grid=(1,),
            in_specs=[pl.BlockSpec((n, f), lambda i: (0, 0))],
            out_specs=pl.BlockSpec((n, f), lambda i: (0, 0)),
            compiler_params=pltpu.CompilerParams(
                dimension_semantics=("arbitrary",),
                vmem_limit_bytes=_VMEM_LIMIT_BYTES),
        )(x2)
        return out2.reshape(orig_shape)

    # ---- large-tensor fallback: two tiled passes over (n, f), no padding ----
    tn = _row_tile(n, f, x.dtype.itemsize, block_bytes)
    grid = (pl.cdiv(n, tn),)
    ragged = (n % tn) != 0

    # pass 1: sum(|x|) into a resident (1,1) accumulator ("arbitrary" axis)
    abs_sum = pl.pallas_call(
        functools.partial(_abs_sum_kernel, tn=tn, n_rows=n, ragged=ragged),
        out_shape=jax.ShapeDtypeStruct((1, 1), jnp.float32),
        grid=grid,
        in_specs=[pl.BlockSpec((tn, f), lambda i: (i, 0))],
        out_specs=pl.BlockSpec((1, 1), lambda i: (0, 0)),
        compiler_params=pltpu.CompilerParams(
            dimension_semantics=("arbitrary",),
            vmem_limit_bytes=_VMEM_LIMIT_BYTES),
    )(x2)

    # pass 2: tiled quantize; abs_sum enters through SMEM, OOB rows of the
    # ragged last block are dropped by Pallas on write-back.
    out2 = pl.pallas_call(
        functools.partial(_global_quant_kernel, n_lv=n_lv,
                          inv_total=1.0 / total),
        out_shape=jax.ShapeDtypeStruct((n, f), x.dtype),
        grid=grid,
        in_specs=[pl.BlockSpec(memory_space=pltpu.MemorySpace.SMEM),
                  pl.BlockSpec((tn, f), lambda i: (i, 0))],
        out_specs=pl.BlockSpec((tn, f), lambda i: (i, 0)),
        compiler_params=pltpu.CompilerParams(
            dimension_semantics=("parallel",),
            vmem_limit_bytes=_VMEM_LIMIT_BYTES),
    )(abs_sum, x2)
    return out2.reshape(orig_shape)


# ----------------------------------------------------------------------------
# channel_wise = 1 (WeightQuant) path
# ----------------------------------------------------------------------------
def _wq_channel_kernel(x_ref, o_ref, *, n_lv, z0, z1, f_true, inv_fm1):
    x = x_ref[...].astype(jnp.float32)                 # [tn, F]
    inv_f = 1.0 / f_true
    m = jnp.sum(jnp.abs(x), axis=1, keepdims=True) * inv_f
    mean = jnp.sum(x, axis=1, keepdims=True) * inv_f
    d = x - mean                                       # two-pass (stable) var
    std = jnp.sqrt(jnp.sum(d * d, axis=1, keepdims=True) * inv_fm1)

    alpha = (1.0 / z0) * std - (z1 / z0) * m           # [tn, 1]
    scale = n_lv / alpha                               # tiny per-row divide
    inv_scale = alpha * (1.0 / n_lv)

    # pre-clamp kept for exact parity with the torch module (only matters in
    # the degenerate alpha <= 0 regime; clip(-3, 6) subsumes it otherwise).
    xc = jnp.maximum(jnp.minimum(x, alpha), -alpha)
    q = jnp.clip(jnp.round(xc * scale), -3.0, 6.0)
    o_ref[...] = (q * inv_scale).astype(o_ref.dtype)


def _wq_channel(x, n_lv, z0, z1, *, block_bytes=_BLOCK_BYTES):
    n, c, h, w = x.shape
    f = c * h * w
    x2 = x.reshape(n, f)                               # no pad, no slice
    tn = _row_tile(n, f, x.dtype.itemsize, block_bytes)
    grid = (pl.cdiv(n, tn),)
    # torch's unbiased std is NaN for a single element; reproduce that rather
    # than dividing by zero.
    inv_fm1 = (1.0 / (f - 1)) if f > 1 else float("nan")

    out2 = pl.pallas_call(
        functools.partial(_wq_channel_kernel, n_lv=n_lv, z0=z0, z1=z1,
                          f_true=float(f), inv_fm1=inv_fm1),
        out_shape=jax.ShapeDtypeStruct((n, f), x.dtype),
        grid=grid,
        in_specs=[pl.BlockSpec((tn, f), lambda i: (i, 0))],
        out_specs=pl.BlockSpec((tn, f), lambda i: (i, 0)),
        compiler_params=pltpu.CompilerParams(
            dimension_semantics=("parallel",),
            vmem_limit_bytes=_VMEM_LIMIT_BYTES),
    )(x2)
    return out2.reshape(n, c, h, w)


# ----------------------------------------------------------------------------
# public wrapper
# ----------------------------------------------------------------------------
def wq_forward(x, wbit=4, channel_wise=0):
    """Pallas implementation of WQ.forward.  x: [N, C, H, W]."""
    n_lv = float(2 ** (wbit - 1) - 1)
    if channel_wise == 1:
        z0, z1 = _Z_TYPICAL[int(wbit)]
        return _wq_channel(x, n_lv, z0, z1)
    return _wq_global(x, n_lv)


# ----------------------------------------------------------------------------
# Pure-JAX reference mirroring the PyTorch forward (returns out, alpha)
# ----------------------------------------------------------------------------
def wq_reference(x, wbit=4, channel_wise=0):
    n_lv = float(2 ** (wbit - 1) - 1)
    if channel_wise == 1:
        z0, z1 = _Z_TYPICAL[int(wbit)]
        m = jnp.mean(jnp.abs(x), axis=(1, 2, 3))
        std = jnp.std(x, axis=(1, 2, 3), ddof=1)
        alpha = (1.0 / z0) * std - (z1 / z0) * m
        a4 = alpha[:, None, None, None]
        xc = jnp.maximum(jnp.minimum(x, a4), -a4)
        scale = n_lv / a4
        q = jnp.clip(jnp.round(xc * scale), -3.0, 6.0)
        return q / scale, alpha
    else:
        m = jnp.mean(jnp.abs(x))
        alpha = 2.0 * m
        scale = n_lv / alpha
        return jnp.round(x * scale) / scale, alpha


if __name__ == "__main__":
    key = jax.random.PRNGKey(0)
    wbit = 4
    n_lv = float(2 ** (wbit - 1) - 1)

    def check(out, ref, alpha, name):
        out = jax.block_until_ready(out)
        assert out.shape == ref.shape, name
        diff = jnp.abs(out - ref)
        qstep = float(jnp.max(jnp.abs(alpha))) / n_lv
        n_off = int(jnp.sum((diff > 1e-5).astype(jnp.int32)))
        max_diff = float(jnp.max(diff))
        # Almost every element must match to float tolerance; a vanishing
        # number may flip by at most one quantization step due to differing
        # float reduction orders (Mosaic vs XLA) in the statistics.
        assert n_off <= max(2, int(2e-3 * out.size)), (name, n_off)
        assert max_diff <= 1.05 * qstep + 1e-5, (name, max_diff)

    # Case 1: lane-dense weight (F = 256). Exercises fused global + channel.
    # Case 2: ragged lanes (F = 27) and N < 8 (full-dim row block).
    for i, (tag, shape) in enumerate([("dense", (8, 4, 8, 8)),
                                      ("ragged_lanes", (6, 3, 3, 3))]):
        x = jax.random.normal(jax.random.fold_in(key, i), shape,
                              dtype=jnp.float32) * 0.1
        out_g = wq_forward(x, wbit=wbit, channel_wise=0)
        ref_g, alpha_g = wq_reference(x, wbit=wbit, channel_wise=0)
        check(out_g, ref_g, alpha_g, f"global/{tag}")

        out_c = wq_forward(x, wbit=wbit, channel_wise=1)
        ref_c, alpha_c = wq_reference(x, wbit=wbit, channel_wise=1)
        check(out_c, ref_c, alpha_c, f"channel/{tag}")

    # Case 3: force the tiled multi-block code paths (ragged last row-block,
    # two-pass global fallback with SMEM scalar) using a tiny block budget.
    x3 = jax.random.normal(jax.random.fold_in(key, 7), (20, 4, 8, 8),
                           dtype=jnp.float32) * 0.1
    out_g = _wq_global(x3, n_lv, fused_max_bytes=0, block_bytes=8 * 1024)
    ref_g, alpha_g = wq_reference(x3, wbit=wbit, channel_wise=0)
    check(out_g, ref_g, alpha_g, "global/fallback_tiled")

    z0, z1 = _Z_TYPICAL[wbit]
    out_c = _wq_channel(x3, n_lv, z0, z1, block_bytes=8 * 1024)
    ref_c, alpha_c = wq_reference(x3, wbit=wbit, channel_wise=1)
    check(out_c, ref_c, alpha_c, "channel/tiled_ragged")

    print("KERNEL_OK")
</pallas_src>

<mosaic_0001>
module attributes {stable_mosaic.version = 11 : i64} {
  func.func @_global_fused_kernel(%arg0: i32, %arg1: memref<8x256xf32, #tpu.memory_space<vmem>>, %arg2: memref<8x256xf32, #tpu.memory_space<vmem>>) attributes {dimension_semantics = [#tpu.dimension_semantics<arbitrary>], iteration_bounds = array<i64: 1>, scalar_prefetch = 0 : i64, scratch_operands = 0 : i64, tpu.core_type = #tpu.core_type<tc>, window_params = [{pipeline_mode = #tpu.pipeline_mode<synchronous>, transform_indices = @transform_0, window_bounds = array<i64: 8, 256>}, {pipeline_mode = #tpu.pipeline_mode<synchronous>, transform_indices = @transform_1, window_bounds = array<i64: 8, 256>}]} {
    %c0 = arith.constant 0 : index
    %c0_0 = arith.constant 0 : index
    %0 = vector.load %arg1[%c0, %c0_0] : memref<8x256xf32, #tpu.memory_space<vmem>>, vector<8x256xf32>
    %1 = math.absf %0 : vector<8x256xf32>
    %2 = vector.shape_cast %1 : vector<8x256xf32> to vector<1x8x256xf32>
    %cst = arith.constant dense<0.000000e+00> : vector<1xf32>
    %3 = vector.multi_reduction <add>, %2, %cst [1, 2] : vector<1x8x256xf32> to vector<1xf32>
    %4 = vector.shape_cast %3 : vector<1xf32> to vector<1x1x1xf32>
    %5 = vector.extract %4[0, 0, 0] : f32 from vector<1x1x1xf32>
    %cst_1 = arith.constant 4.8828125E-4 : f32
    %6 = arith.mulf %5, %cst_1 : f32
    %cst_2 = arith.constant 2.000000e+00 : f32
    %7 = arith.mulf %cst_2, %6 : f32
    %cst_3 = arith.constant 7.000000e+00 : f32
    %8 = arith.divf %cst_3, %7 : f32
    %cst_4 = arith.constant 0.142857149 : f32
    %9 = arith.mulf %7, %cst_4 : f32
    %10 = vector.broadcast %8 : f32 to vector<8x256xf32>
    %11 = arith.mulf %0, %10 : vector<8x256xf32>
    %12 = math.roundeven %11 : vector<8x256xf32>
    %13 = vector.broadcast %9 : f32 to vector<8x256xf32>
    %14 = arith.mulf %12, %13 : vector<8x256xf32>
    %c0_5 = arith.constant 0 : index
    %c0_6 = arith.constant 0 : index
    %15 = vector.load %arg2[%c0_5, %c0_6] : memref<8x256xf32, #tpu.memory_space<vmem>>, vector<8x256xf32>
    tpu.vector_store %arg2[%c0_5, %c0_6], %14 {strides = array<i32>} : memref<8x256xf32, #tpu.memory_space<vmem>>, vector<8x256xf32>,
    return
  }
  func.func @transform_0(%arg0: i32) -> (i32, i32) {
    %c0_i32 = arith.constant 0 : i32
    %c0_i32_0 = arith.constant 0 : i32
    %c0_i32_1 = arith.constant 0 : i32
    return %c0_i32, %c0_i32_0 : i32, i32
  }
  func.func @transform_1(%arg0: i32) -> (i32, i32) {
    %c0_i32 = arith.constant 0 : i32
    %c0_i32_0 = arith.constant 0 : i32
    %c0_i32_1 = arith.constant 0 : i32
    return %c0_i32, %c0_i32_0 : i32, i32
  }
}

</mosaic_0001>

<bundles_post_ra>
// kernel: tpu_custom_call.1
= control target key start
LH: loop header
LB: loop body
LE: loop exit
PB: predicated region body
PF: predicated region fallthrough
CT: control target
= control target key end

     0   :  { %6 = vsyncpa [#allocation3], 0  ;;  %s182_s0 = inlined_call_operand.hbm [shape: f32[8,256], index: 0, kind: input, shape index: {}]   ;;  %s183_s1 = inlined_call_operand.hbm [shape: f32[8,256], index: 1, kind: output, shape index: {}]  }
   0x1   :  { %7 = vsyncpa [#allocation4], 0  ;;  %s13_s8 = sshll.u32 %s182_s0, 4  ;;  %s160_s9 = smov [#allocation2]   ;;  %s14_s8 = int_to_ptr.hbm [resolvable:$true] %s13_s8 }
   0x2   :  { %s15_s10 = sshll.u32 %s160_s9, 4  ;;  %s16_s10 = int_to_ptr.vmem [resolvable:$true] %s15_s10 }
   0x3   :  { %18 = dma.hbm_to_vmem [thread:$0]  %s14_s8, 256, %s16_s10, [#allocation3]  }
   0x4   :  { %156 = dma.done.wait [#allocation3], 256  }
   0x5   :  { %157 = vsyncadd [#allocation3], 4294967040  ;;  %v23_v0 = vld [vmem:[#allocation2] sm:$0xff]  ;;  %v24_v1 = vld [vmem:[#allocation2 + $0x8] sm:$0xff]  ;;  %s161_s16 = smov [#allocation5]   ;;  %s74_s20 = sshll.u32 %s183_s1, 4  ;;  %s75_s20 = int_to_ptr.hbm [resolvable:$true] %s74_s20 }
   0x6   :  { %v25_v2 = vand.u32 2147483647, %v23_v0  ;;  %v26_v3 = vand.u32 2147483647, %v24_v1  ;;  %s72_s17 = sshll.u32 %s161_s16, 4  ;;  %s73_s17 = int_to_ptr.vmem [resolvable:$true] %s72_s17 }
   0x8   :  { %v27_v4 = vadd.f32 %v26_v3, %v25_v2 }
   0xa   :  { %28 = vadd.xlane.f32.xlu0 %v27_v4 }
  0x7d   :  { %v29_v5 = vpop.xlane.xlu0 %28 }
  0x7e   :  { %v30_v6 = vrot.slane %v29_v5, 4 }
  0x80   :  { %v31_v7 = vadd.f32 %v30_v6, %v29_v5 }
  0x82   :  { %v32_v8 = vrot.slane %v31_v7, 2 }
  0x84   :  { %v33_v9 = vadd.f32 %v32_v8, %v31_v7 }
  0x86   :  { %v34_v10 = vrot.slane %v33_v9, 1 }
  0x88   :  { %v35_v11 = vadd.f32 %v34_v10, %v33_v9 }
  0x8a   :  { %84 = vpush %v35_v11 }
  0xbb   :  { %s85_s0 = spop %84 }
  0xbc   :  { %s37_s11 = smul.f32 0.00048828125, %s85_s0 }
  0xbe   :  { %s175_s12 = smul.f32 2.0, %s37_s11 }
  0xc0   :  { %v39_v12 = vstv %s175_s12  ;;  %s56_s15 = smul.f32 0.14285715, %s175_s12 }
  0xc1   :  { %106 = vrcp.f32 %v39_v12  ;;  %v51_v16 = vand.u32 2147483648, %v39_v12  ;;  %v49_v18 = vand.u32 2147483647, %v39_v12  ;;  %vm45_vm1 = vweird.f32 %v39_v12 }
  0xc2   :  { %v62_v38 = vstv %s56_s15 }
  0xc3   :  { %v52_v20 = vor.u32 1.1754944e-38, %v51_v16  ;;  %vm50_vm3 = vcmp.eq.f32.partialorder %v49_v18, 8.507059e+37 }
  0xc7   :  { %v107_v13 = vpop.eup %106 }
  0xc8   :  { %v41_v14 = vmul.f32 %v107_v13, %v39_v12  ;;  %vm46_vm0 = vweird.f32 %v107_v13 }
  0xc9   :  { %vm47_vm2 = vmor %vm45_vm1, %vm46_vm0 }
  0xca   :  { %v42_v15 = vsub.f32 1.0, %v41_v14 }
  0xcc   :  { %v43_v17 = vmul.f32 %v107_v13, %v42_v15 }
  0xce   :  { %v44_v19 = vadd.f32 %v107_v13, %v43_v17 }
  0xd0   :  { %v48_v21 = vsel %vm47_vm2, %v107_v13, %v44_v19 }
  0xd1   :  { %v53_v22 = vsel %vm50_vm3, %v52_v20, %v48_v21 }
  0xd2   :  { %86 = vpush %v53_v22 }
 0x103   :  { %s87_s13 = spop %86 }
 0x104   :  { %s55_s14 = smul.f32 7.0, %s87_s13 }
 0x106   :  { %v57_v23 = vstv %s55_s14 }
 0x107   :  { %v58_v24 = vmul.f32 %v57_v23, %v23_v0  ;;  %v59_v25 = vmul.f32 %v57_v23, %v24_v1 }
 0x109   :  { %v90_v26 = vcvt.f32.s32 %v58_v24  ;;  %v98_v27 = vcvt.f32.s32 %v59_v25  ;;  %v88_v29 = vand.u32 2147483647, %v58_v24  ;;  %v93_v32 = vand.u32 2147483648, %v58_v24 }
 0x10a   :  { %v96_v33 = vand.u32 2147483647, %v59_v25  ;;  %v101_v35 = vand.u32 2147483648, %v59_v25 }
 0x10b   :  { %v91_v28 = vcvt.s32.f32 %v90_v26  ;;  %v99_v30 = vcvt.s32.f32 %v98_v27  ;;  %vm89_vm4 = vcmp.lt.f32.partialorder %v88_v29, 8388608.0 }
 0x10c   :  { %vm97_vm5 = vcmp.lt.f32.partialorder %v96_v33, 8388608.0 }
 0x10d   :  { %v92_v31 = vand.u32 2147483647, %v91_v28  ;;  %v100_v34 = vand.u32 2147483647, %v99_v30 }
 0x10f   :  { %v94_v36 = vor.u32 %v93_v32, %v92_v31  ;;  %v102_v37 = vor.u32 %v101_v35, %v100_v34 }
 0x111   :  { %v95_v39 = vsel %vm89_vm4, %v94_v36, %v58_v24  ;;  %v103_v40 = vsel %vm97_vm5, %v102_v37, %v59_v25 }
 0x112   :  { %v63_v41 = vmul.f32 %v95_v39, %v62_v38  ;;  %v64_v42 = vmul.f32 %v103_v40, %v62_v38 }
 0x114   :  { %65 = vst [vmem:[#allocation5] sm:$0xff] %v63_v41 }
 0x115   :  { %66 = vst [vmem:[#allocation5 + $0x8] sm:$0xff] %v64_v42 }
 0x116   :  { %77 = dma.vmem_to_hbm [thread:$0]  %s73_s17, 256, %s75_s20, [#allocation4]  }
 0x117   :  { %158 = dma.done.wait [#allocation4], 256  }
 0x118   :  { %159 = vsyncadd [#allocation4], 4294967040 }
 0x119   :  { %82 = vsyncpa [#allocation3], 1 }
 0x11a   :  { %83 = vsyncpa [#allocation4], 1 }

</bundles_post_ra>
